<compile_context>
chip_gen: v7x
topology: tpu7x:2x2x1
jax: 0.10.0
libtpu: 0.0.40
codegen_flags: <defaults>
</compile_context>

<pallas_src>
import jax
import jax.numpy as jnp
from jax.experimental import pallas as pl
from jax.experimental.pallas import tpu as pltpu


def _recommender_kernel(idx_ref, putab_ref, pctab_ref, b1_ref, w2_ref, b2_ref,
                        o_ref):
    """One fused step over a tile of `tm` (user, course) pairs.

    Shapes (batch on the lane axis):
      idx_ref    : [2, tm]           int32   (row 0 = users, row 1 = courses)
      putab_ref  : [H, n_users]      bf16    (W1[:E] pre-folded user table)
      pctab_ref  : [H, n_courses]    bf16    (W1[E:] pre-folded course table)
      b1_ref     : [H, 1]            f32
      w2_ref     : [H, 1]            f32
      b2_ref     : [1, 1]            f32     (SMEM scalar)
      o_ref      : [1, tm]           f32
    """
    cdt = putab_ref.dtype
    tm = idx_ref.shape[1]
    n_users = putab_ref.shape[1]
    n_courses = pctab_ref.shape[1]

    u_idx = idx_ref[0:1, :]                                           # [1, tm]
    c_idx = idx_ref[1:2, :]                                           # [1, tm]

    # ---- fused embedding-gather + fc1: one-hot matmuls on the MXU ----------
    # W1 is already folded into the tables, so each matmul gathers the
    # projected row directly (exact: one non-zero per one-hot column).
    # NOTE: out-of-range indices produce a zero row (PyTorch would raise).
    u_onehot = (jax.lax.broadcasted_iota(jnp.int32, (n_users, tm), 0)
                == u_idx).astype(cdt)                                 # [n_users, tm]
    c_onehot = (jax.lax.broadcasted_iota(jnp.int32, (n_courses, tm), 0)
                == c_idx).astype(cdt)                                 # [n_courses, tm]

    h = (jnp.dot(putab_ref[...], u_onehot,
                 preferred_element_type=jnp.float32)
         + jnp.dot(pctab_ref[...], c_onehot,
                   preferred_element_type=jnp.float32)
         + b1_ref[...])                                               # [H, tm] f32
    h = jnp.maximum(h, 0.0)                                           # ReLU
    # dropout == identity in eval mode.

    # ---- fc2: VPU multiply + sublane reduction -> lane-dense [1, tm] -------
    out = jnp.sum(h * w2_ref[...], axis=0, keepdims=True) + b2_ref[0, 0]
    o_ref[...] = out.astype(o_ref.dtype)


def course_recommender_forward(users, courses, params, *, block_b=512,
                               compute_dtype=jnp.bfloat16):
    """users, courses: int32 [B]; returns float32 [B, 1]."""
    user_tab = params["user_embedding"]      # [n_users, E] f32
    course_tab = params["course_embedding"]  # [n_courses, E] f32
    w1 = params["w1"]                        # [2E, H]
    b1 = params["b1"]                        # [H]
    w2 = params["w2"]                        # [H, 1]
    b2 = params["b2"]                        # [1, 1]

    n_users, E = user_tab.shape
    n_courses = course_tab.shape[0]
    H = w1.shape[1]
    B = users.shape[0]

    # ---- fold fc1 (and the concat) into the embedding tables ---------------
    #   fc1(cat(u_emb, c_emb)) = u_tab[u] @ W1[:E] + c_tab[c] @ W1[E:] + b1
    proj_utab = jnp.dot(user_tab, w1[:E, :]).T.astype(compute_dtype)     # [H, n_users]
    proj_ctab = jnp.dot(course_tab, w1[E:, :]).T.astype(compute_dtype)   # [H, n_courses]
    b1c = jnp.asarray(b1, jnp.float32).reshape(H, 1)                     # [H, 1]
    w2c = jnp.asarray(w2, jnp.float32).reshape(H, 1)                     # [H, 1]
    b2s = jnp.asarray(b2, jnp.float32).reshape(1, 1)                     # [1, 1] -> SMEM

    # ---- pack + pad the index batch (batch lives on the lane axis) ---------
    nt = pl.cdiv(B, block_b)
    b_pad = nt * block_b
    idx = jnp.stack([users.astype(jnp.int32), courses.astype(jnp.int32)])  # [2, B]
    idx_p = jnp.pad(idx, ((0, 0), (0, b_pad - B)))                         # [2, b_pad]

    # ---- scoped-VMEM budget: residents (x2 buffers) + per-tile buffers -----
    cdt_bytes = jnp.dtype(compute_dtype).itemsize
    resident = H * (n_users + n_courses) * cdt_bytes + 2 * H * 4
    io_tiles = 2 * block_b * 4 + block_b * 4                     # idx in + out
    onehot = (n_users + n_courses) * block_b * cdt_bytes         # in-kernel temps
    acts = 2 * H * block_b * 4
    vmem_bytes = 2 * (resident + io_tiles) + onehot + acts + (8 << 20)
    vmem_bytes = int(min(max(vmem_bytes, 16 << 20), 48 << 20))   # v7x ceiling headroom

    out = pl.pallas_call(
        _recommender_kernel,
        out_shape=jax.ShapeDtypeStruct((1, b_pad), jnp.float32),
        grid=(nt,),
        in_specs=[
            pl.BlockSpec((2, block_b), lambda i: (0, i)),        # packed indices tile
            pl.BlockSpec((H, n_users), lambda i: (0, 0)),        # projected user table (resident)
            pl.BlockSpec((H, n_courses), lambda i: (0, 0)),      # projected course table (resident)
            pl.BlockSpec((H, 1), lambda i: (0, 0)),              # b1 (resident)
            pl.BlockSpec((H, 1), lambda i: (0, 0)),              # w2 (resident)
            pl.BlockSpec(memory_space=pltpu.MemorySpace.SMEM),   # b2 scalar
        ],
        out_specs=pl.BlockSpec((1, block_b), lambda i: (0, i)),  # lane-dense output
        compiler_params=pltpu.CompilerParams(
            # batch tiles are independent -> megacore-shardable on v7x (needs nt >= 2)
            dimension_semantics=("parallel",),
            vmem_limit_bytes=vmem_bytes),
    )(idx_p, proj_utab, proj_ctab, b1c, w2c, b2s)

    return out[0, :B].reshape(B, 1)


def init_params(key, n_users, n_courses, embed_size, hidden_dim):
    k0, k1, k2, k3, k4, k5 = jax.random.split(key, 6)
    # nn.Embedding default init: N(0, 1)
    user_embedding = jax.random.normal(k0, (n_users, embed_size), jnp.float32)
    course_embedding = jax.random.normal(k1, (n_courses, embed_size), jnp.float32)
    # nn.Linear default init: U(-1/sqrt(fan_in), 1/sqrt(fan_in))
    fan1 = 2 * embed_size
    lim1 = 1.0 / jnp.sqrt(fan1)
    w1 = jax.random.uniform(k2, (fan1, hidden_dim), jnp.float32, -lim1, lim1)
    b1 = jax.random.uniform(k3, (hidden_dim,), jnp.float32, -lim1, lim1)
    fan2 = hidden_dim
    lim2 = 1.0 / jnp.sqrt(fan2)
    w2 = jax.random.uniform(k4, (fan2, 1), jnp.float32, -lim2, lim2)
    b2 = jax.random.uniform(k5, (1, 1), jnp.float32, -lim2, lim2)
    return {
        "user_embedding": user_embedding,
        "course_embedding": course_embedding,
        "w1": w1, "b1": b1, "w2": w2, "b2": b2,
    }


if __name__ == "__main__":
    n_users, n_courses = 64, 96
    embed_size, hidden_dim = 32, 32
    batch = 8

    key = jax.random.PRNGKey(0)
    kp, ku, kc = jax.random.split(key, 3)
    params = init_params(kp, n_users, n_courses, embed_size, hidden_dim)

    users = jax.random.randint(ku, (batch,), 0, n_users, dtype=jnp.int32)
    courses = jax.random.randint(kc, (batch,), 0, n_courses, dtype=jnp.int32)

    forward = jax.jit(course_recommender_forward)
    out = jax.block_until_ready(forward(users, courses, params))

    # Reference in plain JAX using the same W1-folded bf16 tables
    # (eval-mode forward of the PyTorch module).
    proj_u = jnp.dot(params["user_embedding"],
                     params["w1"][:embed_size]).T.astype(jnp.bfloat16)   # [H, n_users]
    proj_c = jnp.dot(params["course_embedding"],
                     params["w1"][embed_size:]).T.astype(jnp.bfloat16)   # [H, n_courses]
    h_ref = (jnp.take(proj_u, users, axis=1).astype(jnp.float32)
             + jnp.take(proj_c, courses, axis=1).astype(jnp.float32)
             + params["b1"][:, None])                                    # [H, B]
    h_ref = jnp.maximum(h_ref, 0.0)
    ref = (h_ref * params["w2"]).sum(axis=0)[:, None] + params["b2"]     # [B, 1]

    assert out.shape == (batch, 1), out.shape
    assert jnp.allclose(out, ref, atol=1e-2, rtol=1e-2), (out, ref)

    print("KERNEL_OK")
</pallas_src>

<mosaic_0001>
module attributes {stable_mosaic.version = 11 : i64} {
  func.func @_recommender_kernel(%arg0: i32, %arg1: memref<2x512xi32, #tpu.memory_space<vmem>>, %arg2: memref<32x64xbf16, #tpu.memory_space<vmem>>, %arg3: memref<32x96xbf16, #tpu.memory_space<vmem>>, %arg4: memref<32x1xf32, #tpu.memory_space<vmem>>, %arg5: memref<32x1xf32, #tpu.memory_space<vmem>>, %arg6: memref<1x1xf32, #tpu.memory_space<smem>>, %arg7: memref<1x512xf32, #tpu.memory_space<vmem>>) attributes {dimension_semantics = [#tpu.dimension_semantics<parallel>], iteration_bounds = array<i64: 1>, scalar_prefetch = 0 : i64, scratch_operands = 0 : i64, tpu.core_type = #tpu.core_type<tc>, window_params = [{transform_indices = @transform_0, window_bounds = array<i64: 2, 512>}, {pipeline_mode = #tpu.pipeline_mode<synchronous>, transform_indices = @transform_1, window_bounds = array<i64: 32, 64>}, {pipeline_mode = #tpu.pipeline_mode<synchronous>, transform_indices = @transform_2, window_bounds = array<i64: 32, 96>}, {pipeline_mode = #tpu.pipeline_mode<synchronous>, transform_indices = @transform_3, window_bounds = array<i64: 32, 1>}, {pipeline_mode = #tpu.pipeline_mode<synchronous>, transform_indices = @transform_4, window_bounds = array<i64: 32, 1>}, {transform_indices = @transform_5, window_bounds = array<i64: 1, 1>}, {transform_indices = @transform_6, window_bounds = array<i64: 1, 512>}]} {
    %c0 = arith.constant 0 : index
    %c0_0 = arith.constant 0 : index
    %0 = vector.load %arg1[%c0, %c0_0] : memref<2x512xi32, #tpu.memory_space<vmem>>, vector<1x512xi32>
    %c1 = arith.constant 1 : index
    %c0_1 = arith.constant 0 : index
    %1 = vector.load %arg1[%c1, %c0_1] : memref<2x512xi32, #tpu.memory_space<vmem>>, vector<1x512xi32>
    %2 = tpu.iota {dimensions = array<i32: 0>} : vector<64x512xi32>
    %3 = vector.broadcast %0 : vector<1x512xi32> to vector<64x512xi32>
    %4 = arith.cmpi eq, %2, %3 : vector<64x512xi32>
    %5 = arith.extui %4 : vector<64x512xi1> to vector<64x512xi32>
    %6 = arith.sitofp %5 : vector<64x512xi32> to vector<64x512xf32>
    %7 = arith.truncf %6 : vector<64x512xf32> to vector<64x512xbf16>
    %8 = tpu.iota {dimensions = array<i32: 0>} : vector<96x512xi32>
    %9 = vector.broadcast %1 : vector<1x512xi32> to vector<96x512xi32>
    %10 = arith.cmpi eq, %8, %9 : vector<96x512xi32>
    %11 = arith.extui %10 : vector<96x512xi1> to vector<96x512xi32>
    %12 = arith.sitofp %11 : vector<96x512xi32> to vector<96x512xf32>
    %13 = arith.truncf %12 : vector<96x512xf32> to vector<96x512xbf16>
    %c0_2 = arith.constant 0 : index
    %c0_3 = arith.constant 0 : index
    %14 = vector.load %arg2[%c0_2, %c0_3] : memref<32x64xbf16, #tpu.memory_space<vmem>>, vector<32x64xbf16>
    %cst = arith.constant dense<0.000000e+00> : vector<32x512xf32>
    %15 = tpu.matmul %14, %7, %cst {dimension_numbers = #tpu.dot_dimension_numbers<[1], [0], [0], [1], [0, 0, 1, 1], [], []>} : vector<32x64xbf16>, vector<64x512xbf16>, vector<32x512xf32> -> vector<32x512xf32>
    %c0_4 = arith.constant 0 : index
    %c0_5 = arith.constant 0 : index
    %16 = vector.load %arg3[%c0_4, %c0_5] : memref<32x96xbf16, #tpu.memory_space<vmem>>, vector<32x96xbf16>
    %cst_6 = arith.constant dense<0.000000e+00> : vector<32x512xf32>
    %17 = tpu.matmul %16, %13, %cst_6 {dimension_numbers = #tpu.dot_dimension_numbers<[1], [0], [0], [1], [0, 0, 1, 1], [], []>} : vector<32x96xbf16>, vector<96x512xbf16>, vector<32x512xf32> -> vector<32x512xf32>
    %18 = arith.addf %15, %17 : vector<32x512xf32>
    %c0_7 = arith.constant 0 : index
    %c0_8 = arith.constant 0 : index
    %19 = vector.load %arg4[%c0_7, %c0_8] : memref<32x1xf32, #tpu.memory_space<vmem>>, vector<32x1xf32>
    %20 = vector.broadcast %19 : vector<32x1xf32> to vector<32x512xf32>
    %21 = arith.addf %18, %20 : vector<32x512xf32>
    %cst_9 = arith.constant 0.000000e+00 : f32
    %22 = vector.broadcast %cst_9 : f32 to vector<32x512xf32>
    %23 = arith.maximumf %21, %22 : vector<32x512xf32>
    %c0_10 = arith.constant 0 : index
    %c0_11 = arith.constant 0 : index
    %24 = vector.load %arg5[%c0_10, %c0_11] : memref<32x1xf32, #tpu.memory_space<vmem>>, vector<32x1xf32>
    %25 = vector.broadcast %24 : vector<32x1xf32> to vector<32x512xf32>
    %26 = arith.mulf %23, %25 : vector<32x512xf32>
    %cst_12 = arith.constant dense<0.000000e+00> : vector<512xf32>
    %27 = vector.multi_reduction <add>, %26, %cst_12 [0] : vector<32x512xf32> to vector<512xf32>
    %28 = vector.shape_cast %27 : vector<512xf32> to vector<1x512xf32>
    %c0_13 = arith.constant 0 : index
    %c0_14 = arith.constant 0 : index
    %29 = memref.load %arg6[%c0_13, %c0_14] : memref<1x1xf32, #tpu.memory_space<smem>>
    %30 = vector.broadcast %29 : f32 to vector<1x512xf32>
    %31 = arith.addf %28, %30 : vector<1x512xf32>
    %c0_15 = arith.constant 0 : index
    %c0_16 = arith.constant 0 : index
    %32 = vector.load %arg7[%c0_15, %c0_16] : memref<1x512xf32, #tpu.memory_space<vmem>>, vector<1x512xf32>
    tpu.vector_store %arg7[%c0_15, %c0_16], %31 {strides = array<i32>} : memref<1x512xf32, #tpu.memory_space<vmem>>, vector<1x512xf32>,
    return
  }
  func.func @transform_0(%arg0: i32) -> (i32, i32) {
    %c0_i32 = arith.constant 0 : i32
    %c0_i32_0 = arith.constant 0 : i32
    return %c0_i32, %arg0 : i32, i32
  }
  func.func @transform_1(%arg0: i32) -> (i32, i32) {
    %c0_i32 = arith.constant 0 : i32
    %c0_i32_0 = arith.constant 0 : i32
    %c0_i32_1 = arith.constant 0 : i32
    return %c0_i32, %c0_i32_0 : i32, i32
  }
  func.func @transform_2(%arg0: i32) -> (i32, i32) {
    %c0_i32 = arith.constant 0 : i32
    %c0_i32_0 = arith.constant 0 : i32
    %c0_i32_1 = arith.constant 0 : i32
    return %c0_i32, %c0_i32_0 : i32, i32
  }
  func.func @transform_3(%arg0: i32) -> (i32, i32) {
    %c0_i32 = arith.constant 0 : i32
    %c0_i32_0 = arith.constant 0 : i32
    %c0_i32_1 = arith.constant 0 : i32
    return %c0_i32, %c0_i32_0 : i32, i32
  }
  func.func @transform_4(%arg0: i32) -> (i32, i32) {
    %c0_i32 = arith.constant 0 : i32
    %c0_i32_0 = arith.constant 0 : i32
    %c0_i32_1 = arith.constant 0 : i32
    return %c0_i32, %c0_i32_0 : i32, i32
  }
  func.func @transform_5(%arg0: i32) -> (i32, i32) {
    %c0_i32 = arith.constant 0 : i32
    %c0_i32_0 = arith.constant 0 : i32
    %c0_i32_1 = arith.constant 0 : i32
    return %c0_i32, %c0_i32_0 : i32, i32
  }
  func.func @transform_6(%arg0: i32) -> (i32, i32) {
    %c0_i32 = arith.constant 0 : i32
    %c0_i32_0 = arith.constant 0 : i32
    return %c0_i32, %arg0 : i32, i32
  }
}

</mosaic_0001>

<bundles_post_ra>
// kernel: course_recommender_forward.1
= control target key start
LH: loop header
LB: loop body
LE: loop exit
PB: predicated region body
PF: predicated region fallthrough
CT: control target
= control target key end

     0   :  { %v28_v0 = vlaneseq  ;;  %v981_v1 = vmov 0   ;;  %v982_v17 = vmov 1.0|1.0   ;;  %s1378_s0 = inlined_call_operand.vmem [shape: s32[2,512], index: 0, kind: input, shape index: {}]   ;;  %s1379_s2 = inlined_call_operand.vmem [shape: bf16[32,96], index: 2, kind: input, shape index: {}]   ;;  %s1380_s1 = inlined_call_operand.vmem [shape: bf16[32,64], index: 1, kind: input, shape index: {}]   ;;  %s1381_s3 = inlined_call_operand.vmem [shape: f32[32,1], index: 3, kind: input, shape index: {}]   ;;  %s1382_s4 = inlined_call_operand.vmem [shape: f32[32,1], index: 4, kind: input, shape index: {}]   ;;  %s1383_s5 = inlined_call_operand.<no memory space> [shape: f32[1,1], index: 5, kind: input, shape index: {}]   ;;  %s1384_s6 = inlined_call_operand.vmem [shape: f32[1,512], index: 6, kind: output, shape index: {}]  }
   0x1   :  { %410 = vmatprep.mubr.bf16.mxu0 %v981_v1  ;;  %463 = vmatprep.mubr.bf16.mxu1 %v981_v1  ;;  %v783_v2 = vld [vmem:[%s1378_s0 + $0x1] ss:$2 sm:$0xf]  ;;  %v609_v16 = vld [vmem:[%s1381_s3 + $0x10] sm:$0xff]  ;;  %v608_v20 = vld [vmem:[%s1381_s3 + $0x8] sm:$0xff] }
   0x2   :  { %v1025_v3 = vshrl.u32 %v28_v0, 7  ;;  %975 = vset.pattern.permute.xlu0 %v981_v1  ;;  %976 = vset.pattern.permute.xlu1 %v981_v1  ;;  %v607_v15 = vld [vmem:[%s1381_s3] sm:$0xff]  ;;  %v610_v23 = vld [vmem:[%s1381_s3 + $0x18] sm:$0xff]  ;;  %v664_v32 = vld [vmem:[%s1382_s4 + $0x8] sm:$0xff] }
   0x3   :  { %613 = vperm.xlu0 %975, %v607_v15   ;;  %623 = vperm.xlu1 %976, %v609_v16   ;;  %v25_v28 = vld [vmem:[%s1378_s0] ss:$2 sm:$0xf]  ;;  %v665_v35 = vld [vmem:[%s1382_s4 + $0x10] sm:$0xff]  ;;  %v666_v37 = vld [vmem:[%s1382_s4 + $0x18] sm:$0xff] }
   0x4   :  { %v1030_v4 = vadd.s32 8, %v1025_v3  ;;  %v43_v5 = vsub.s32 1, %v1025_v3  ;;  %v51_v6 = vsub.s32 3, %v1025_v3  ;;  %v39_v7 = vsub.s32 0, %v1025_v3  ;;  %v663_v30 = vld [vmem:[%s1382_s4] sm:$0xff]  ;;  %v978_v38 = vld [vmem:[%s1379_s2 + $0x8] sm:$0xff]  }
   0x5   :  { %v47_v8 = vsub.s32 2, %v1025_v3  ;;  %v1037_v9 = vadd.s32 16, %v1025_v3  ;;  %v1052_v13 = vadd.s32 24, %v1025_v3  ;;  %v1086_v18 = vadd.s32 32, %v1025_v3  ;;  %v977_v36 = vld [vmem:[%s1379_s2] sm:$0xff]   ;;  %v980_v40 = vld [vmem:[%s1380_s1 + $0x8] sm:$0xff]  }
   0x6   :  { %v1041_v10 = vrot.slane %v783_v2, %v43_v5  ;;  %v1045_v11 = vrot.slane %v783_v2, %v51_v6  ;;  %v1049_v12 = vrot.slane %v783_v2, %v39_v7  ;;  %v1089_v19 = vadd.s32 40, %v1025_v3  ;;  %v979_v39 = vld [vmem:[%s1380_s1] sm:$0xff]  }
   0x7   :  { %v1056_v14 = vrot.slane %v783_v2, %v47_v8  ;;  %v1118_v21 = vadd.s32 48, %v1025_v3  ;;  %v1121_v22 = vadd.s32 56, %v1025_v3  ;;  %618 = vperm.xlu0 %975, %v608_v20   ;;  %628 = vperm.xlu1 %976, %v610_v23   ;;  %v165_v24 = vadd.s32 64, %v1025_v3 }
   0x8   :  { %vm186_vm0 = vcmp.eq.s32.totalorder %v1025_v3, %v1041_v10  ;;  %vm190_vm1 = vcmp.eq.s32.totalorder %v1030_v4, %v1041_v10  ;;  %vm188_vm2 = vcmp.eq.s32.totalorder %v1025_v3, %v1045_v11  ;;  %vm192_vm3 = vcmp.eq.s32.totalorder %v1030_v4, %v1045_v11 }
   0x9   :  { %vm866_vm4 = vmpackc.low %vm190_vm1, %vm186_vm0  ;;  %vm185_vm5 = vcmp.eq.s32.totalorder %v1025_v3, %v1049_v12  ;;  %vm189_vm6 = vcmp.eq.s32.totalorder %v1030_v4, %v1049_v12  ;;  %vm187_vm7 = vcmp.eq.s32.totalorder %v1025_v3, %v1056_v14  ;;  %vm191_vm8 = vcmp.eq.s32.totalorder %v1030_v4, %v1056_v14 }
   0xa   :  { %867 = vmatprep.subr.msk.bf16.mxu0 %vm866_vm4, %v982_v17  ;;  %vm892_vm9 = vmpackc.low %vm192_vm3, %vm188_vm2  ;;  %vm194_vm10 = vcmp.eq.s32.totalorder %v1037_v9, %v1041_v10  ;;  %vm198_vm11 = vcmp.eq.s32.totalorder %v1052_v13, %v1041_v10  ;;  %vm196_vm13 = vcmp.eq.s32.totalorder %v1037_v9, %v1045_v11  ;;  %vm200_vm14 = vcmp.eq.s32.totalorder %v1052_v13, %v1045_v11 }
   0xb   :  { %893 = vmatprep.subr.msk.bf16.mxu1 %vm892_vm9, %v982_v17  ;;  %vm868_vm12 = vmpackc.low %vm189_vm6, %vm185_vm5  ;;  %vm193_vm0 = vcmp.eq.s32.totalorder %v1037_v9, %v1049_v12  ;;  %vm197_vm1 = vcmp.eq.s32.totalorder %v1052_v13, %v1049_v12  ;;  %vm195_vm3 = vcmp.eq.s32.totalorder %v1037_v9, %v1056_v14  ;;  %vm199_vm4 = vcmp.eq.s32.totalorder %v1052_v13, %v1056_v14 }
   0xc   :  { %869 = vmatpush1.bf16.msk.msra.mxu0 %vm868_vm12, %v982_v17  ;;  %vm894_vm15 = vmpackc.low %vm191_vm8, %vm187_vm7  ;;  %vm202_vm6 = vcmp.eq.s32.totalorder %v1086_v18, %v1041_v10  ;;  %vm206_vm7 = vcmp.eq.s32.totalorder %v1089_v19, %v1041_v10  ;;  %vm204_vm9 = vcmp.eq.s32.totalorder %v1086_v18, %v1045_v11  ;;  %vm201_vm12 = vcmp.eq.s32.totalorder %v1086_v18, %v1049_v12 }
   0xd   :  { %895 = vmatpush1.bf16.msk.msra.mxu1 %vm894_vm15, %v982_v17  ;;  %vm870_vm2 = vmpackc.low %vm198_vm11, %vm194_vm10  ;;  %vm208_vm10 = vcmp.eq.s32.totalorder %v1089_v19, %v1045_v11  ;;  %vm203_vm15 = vcmp.eq.s32.totalorder %v1086_v18, %v1056_v14  ;;  %v166_v25 = vadd.s32 72, %v1025_v3  ;;  %v167_v26 = vadd.s32 80, %v1025_v3  ;;  %669 = vperm.xlu0 %975, %v663_v30  }
   0xe   :  { %871 = vmatprep.subr.msk.bf16.mxu0 %vm870_vm2, %v982_v17  ;;  %vm896_vm5 = vmpackc.low %vm200_vm14, %vm196_vm13  ;;  %vm205_vm13 = vcmp.eq.s32.totalorder %v1089_v19, %v1049_v12  ;;  %vm210_vm2 = vcmp.eq.s32.totalorder %v1118_v21, %v1041_v10  ;;  %v168_v27 = vadd.s32 88, %v1025_v3  ;;  %v1202_v29 = vrot.slane %v25_v28, %v43_v5  ;;  %674 = vperm.xlu1 %976, %v664_v32  }
   0xf   :  { %897 = vmatprep.subr.msk.bf16.mxu1 %vm896_vm5, %v982_v17  ;;  %vm872_vm8 = vmpackc.low %vm197_vm1, %vm193_vm0  ;;  %vm207_vm0 = vcmp.eq.s32.totalorder %v1089_v19, %v1056_v14  ;;  %vm212_vm5 = vcmp.eq.s32.totalorder %v1118_v21, %v1045_v11  ;;  %v1212_v31 = vrot.slane %v25_v28, %v51_v6  ;;  %v1224_v33 = vrot.slane %v25_v28, %v39_v7 }
  0x10   :  { %873 = vmatpush1.bf16.msk.msra.mxu0 %vm872_vm8, %v982_v17  ;;  %vm898_vm11 = vmpackc.low %vm199_vm4, %vm195_vm3  ;;  %vm214_vm3 = vcmp.eq.s32.totalorder %v1121_v22, %v1041_v10  ;;  %vm209_vm8 = vcmp.eq.s32.totalorder %v1118_v21, %v1049_v12  ;;  %v1235_v34 = vrot.slane %v25_v28, %v47_v8 }
  0x11   :  { %899 = vmatpush1.bf16.msk.msra.mxu1 %vm898_vm11, %v982_v17  ;;  %vm874_vm14 = vmpackc.low %vm206_vm7, %vm202_vm6  ;;  %vm216_vm6 = vcmp.eq.s32.totalorder %v1121_v22, %v1045_v11  ;;  %vm211_vm11 = vcmp.eq.s32.totalorder %v1118_v21, %v1056_v14  ;;  %679 = vperm.xlu0 %975, %v665_v35  }
  0x12   :  { %875 = vmatprep.subr.msk.bf16.mxu0 %vm874_vm14, %v982_v17  ;;  %vm900_vm1 = vmpackc.low %vm208_vm10, %vm204_vm9  ;;  %vm213_vm9 = vcmp.eq.s32.totalorder %v1121_v22, %v1049_v12  ;;  %vm218_vm14 = vcmp.eq.s32.totalorder %v165_v24, %v1041_v10  ;;  %684 = vperm.xlu1 %976, %v666_v37  }
  0x13   :  { %901 = vmatprep.subr.msk.bf16.mxu1 %vm900_vm1, %v982_v17  ;;  %vm876_vm4 = vmpackc.low %vm205_vm13, %vm201_vm12  ;;  %vm215_vm12 = vcmp.eq.s32.totalorder %v1121_v22, %v1056_v14  ;;  %vm220_vm1 = vcmp.eq.s32.totalorder %v165_v24, %v1045_v11 }
  0x14   :  { %877 = vmatpush1.bf16.msk.msra.mxu0 %vm876_vm4, %v982_v17  ;;  %vm902_vm7 = vmpackc.low %vm207_vm0, %vm203_vm15  ;;  %vm222_vm15 = vcmp.eq.s32.totalorder %v166_v25, %v1041_v10  ;;  %vm217_vm4 = vcmp.eq.s32.totalorder %v165_v24, %v1049_v12 }
  0x15   :  { %903 = vmatpush1.bf16.msk.msra.mxu1 %vm902_vm7, %v982_v17  ;;  %vm878_vm10 = vmpackc.low %vm214_vm3, %vm210_vm2  ;;  %vm224_vm2 = vcmp.eq.s32.totalorder %v166_v25, %v1045_v11  ;;  %vm219_vm7 = vcmp.eq.s32.totalorder %v165_v24, %v1056_v14 }
  0x16   :  { %879 = vmatprep.subr.msk.bf16.mxu0 %vm878_vm10, %v982_v17  ;;  %vm904_vm13 = vmpackc.low %vm216_vm6, %vm212_vm5  ;;  %vm221_vm5 = vcmp.eq.s32.totalorder %v166_v25, %v1049_v12  ;;  %vm226_vm10 = vcmp.eq.s32.totalorder %v167_v26, %v1041_v10 }
  0x17   :  { %905 = vmatprep.subr.msk.bf16.mxu1 %vm904_vm13, %v982_v17  ;;  %vm880_vm0 = vmpackc.low %vm213_vm9, %vm209_vm8  ;;  %vm223_vm8 = vcmp.eq.s32.totalorder %v166_v25, %v1056_v14  ;;  %vm228_vm13 = vcmp.eq.s32.totalorder %v167_v26, %v1045_v11 }
  0x18   :  { %881 = vmatpush1.bf16.msk.msra.mxu0 %vm880_vm0, %v982_v17  ;;  %vm906_vm3 = vmpackc.low %vm215_vm12, %vm211_vm11  ;;  %vm230_vm11 = vcmp.eq.s32.totalorder %v168_v27, %v1041_v10  ;;  %vm225_vm0 = vcmp.eq.s32.totalorder %v167_v26, %v1049_v12 }
  0x19   :  { %907 = vmatpush1.bf16.msk.msra.mxu1 %vm906_vm3, %v982_v17  ;;  %vm882_vm6 = vmpackc.low %vm222_vm15, %vm218_vm14  ;;  %vm232_vm14 = vcmp.eq.s32.totalorder %v168_v27, %v1045_v11  ;;  %vm227_vm3 = vcmp.eq.s32.totalorder %v167_v26, %v1056_v14 }
  0x1a   :  { %883 = vmatprep.subr.msk.bf16.mxu0 %vm882_vm6, %v982_v17  ;;  %vm908_vm9 = vmpackc.low %vm224_vm2, %vm220_vm1  ;;  %vm229_vm1 = vcmp.eq.s32.totalorder %v168_v27, %v1049_v12  ;;  %vm54_vm6 = vcmp.eq.s32.totalorder %v1025_v3, %v1202_v29 }
  0x1b   :  { %909 = vmatprep.subr.msk.bf16.mxu1 %vm908_vm9, %v982_v17  ;;  %vm884_vm12 = vmpackc.low %vm221_vm5, %vm217_vm4  ;;  %vm231_vm4 = vcmp.eq.s32.totalorder %v168_v27, %v1056_v14  ;;  %vm56_vm9 = vcmp.eq.s32.totalorder %v1025_v3, %v1212_v31 }
  0x1c   :  { %885 = vmatpush1.bf16.msk.msra.mxu0 %vm884_vm12, %v982_v17  ;;  %vm910_vm15 = vmpackc.low %vm223_vm8, %vm219_vm7  ;;  %vm58_vm7 = vcmp.eq.s32.totalorder %v1030_v4, %v1202_v29  ;;  %vm371_vm12 = vcmask 785408  }
  0x1d   :  { %911 = vmatpush1.bf16.msk.msra.mxu1 %vm910_vm15, %v982_v17  ;;  %vm886_vm2 = vmpackc.low %vm230_vm11, %vm226_vm10  ;;  %vm60_vm10 = vcmp.eq.s32.totalorder %v1030_v4, %v1212_v31 }
  0x1e   :  { %887 = vmatprep.subr.msk.bf16.mxu0 %vm886_vm2, %v982_v17  ;;  %vm912_vm5 = vmpackc.low %vm232_vm14, %vm228_vm13  ;;  %vm53_vm13 = vcmp.eq.s32.totalorder %v1025_v3, %v1224_v33  ;;  %vm57_vm14 = vcmp.eq.s32.totalorder %v1030_v4, %v1224_v33 }
  0x1f   :  { %913 = vmatprep.subr.msk.bf16.mxu1 %vm912_vm5, %v982_v17  ;;  %vm888_vm8 = vmpackc.low %vm229_vm1, %vm225_vm0  ;;  %vm55_vm0 = vcmp.eq.s32.totalorder %v1025_v3, %v1235_v34  ;;  %vm59_vm1 = vcmp.eq.s32.totalorder %v1030_v4, %v1235_v34 }
  0x20   :  { %889 = vmatpush1.bf16.msk.msra.mxu0 %vm888_vm8, %v982_v17  ;;  %vm914_vm11 = vmpackc.low %vm231_vm4, %vm227_vm3  ;;  %vm62_vm3 = vcmp.eq.s32.totalorder %v1037_v9, %v1202_v29  ;;  %vm66_vm4 = vcmp.eq.s32.totalorder %v1052_v13, %v1202_v29 }
  0x21   :  { %915 = vmatpush1.bf16.msk.msra.mxu1 %vm914_vm11, %v982_v17  ;;  %vm920_vm15 = vmpackc.low %vm58_vm7, %vm54_vm6  ;;  %vm64_vm6 = vcmp.eq.s32.totalorder %v1037_v9, %v1212_v31  ;;  %vm68_vm7 = vcmp.eq.s32.totalorder %v1052_v13, %v1212_v31 }
  0x22   :  { %921 = vmatprep.subr.msk.bf16.mxu0 %vm920_vm15, %v982_v17  ;;  %vm938_vm2 = vmpackc.low %vm60_vm10, %vm56_vm9  ;;  %vm61_vm9 = vcmp.eq.s32.totalorder %v1037_v9, %v1224_v33  ;;  %vm65_vm10 = vcmp.eq.s32.totalorder %v1052_v13, %v1224_v33 }
  0x23   :  { %890 = vmatmul.mubr.msk.bf16.vlgmr.msra.gmra.mrb[0].mxu0 %vm371_vm12, %v977_v36  ;;  %939 = vmatprep.subr.msk.bf16.mxu1 %vm938_vm2, %v982_v17  ;;  %vm922_vm5 = vmpackc.low %vm57_vm14, %vm53_vm13  ;;  %vm63_vm13 = vcmp.eq.s32.totalorder %v1037_v9, %v1235_v34  ;;  %vm67_vm14 = vcmp.eq.s32.totalorder %v1052_v13, %v1235_v34 }
  0x24   :  { %916 = vmatmul.mubr.msk.bf16.vlgmr.msra.gmra.mrb[0].mxu1 %vm371_vm12, %v977_v36  ;;  %923 = vmatpush1.bf16.msk.msra.mxu0 %vm922_vm5, %v982_v17  ;;  %vm940_vm8 = vmpackc.low %vm59_vm1, %vm55_vm0  ;;  %vm70_vm0 = vcmp.eq.s32.totalorder %v1086_v18, %v1202_v29  ;;  %vm74_vm1 = vcmp.eq.s32.totalorder %v1089_v19, %v1202_v29 }
  0x25   :  { %941 = vmatpush1.bf16.msk.msra.mxu1 %vm940_vm8, %v982_v17  ;;  %vm924_vm11 = vmpackc.low %vm66_vm4, %vm62_vm3  ;;  %420 = vmatprep.mubr.bf16.mxu0 %v981_v1  ;;  %vm72_vm3 = vcmp.eq.s32.totalorder %v1086_v18, %v1212_v31  ;;  %vm76_vm4 = vcmp.eq.s32.totalorder %v1089_v19, %v1212_v31 }
  0x26   :  { %925 = vmatprep.subr.msk.bf16.mxu0 %vm924_vm11, %v982_v17  ;;  %vm942_vm15 = vmpackc.low %vm68_vm7, %vm64_vm6  ;;  %473 = vmatprep.mubr.bf16.mxu1 %v981_v1  ;;  %vm69_vm6 = vcmp.eq.s32.totalorder %v1086_v18, %v1224_v33  ;;  %vm73_vm7 = vcmp.eq.s32.totalorder %v1089_v19, %v1224_v33 }
  0x27   :  { %943 = vmatprep.subr.msk.bf16.mxu1 %vm942_vm15, %v982_v17  ;;  %vm926_vm2 = vmpackc.low %vm65_vm10, %vm61_vm9  ;;  %vm71_vm9 = vcmp.eq.s32.totalorder %v1086_v18, %v1235_v34  ;;  %vm75_vm10 = vcmp.eq.s32.totalorder %v1089_v19, %v1235_v34 }
  0x28   :  { %927 = vmatpush1.bf16.msk.msra.mxu0 %vm926_vm2, %v982_v17  ;;  %vm944_vm5 = vmpackc.low %vm67_vm14, %vm63_vm13  ;;  %vm78_vm13 = vcmp.eq.s32.totalorder %v1118_v21, %v1202_v29  ;;  %vm82_vm14 = vcmp.eq.s32.totalorder %v1121_v22, %v1202_v29 }
  0x29   :  { %945 = vmatpush1.bf16.msk.msra.mxu1 %vm944_vm5, %v982_v17  ;;  %vm928_vm8 = vmpackc.low %vm74_vm1, %vm70_vm0  ;;  %vm80_vm0 = vcmp.eq.s32.totalorder %v1118_v21, %v1212_v31  ;;  %vm84_vm1 = vcmp.eq.s32.totalorder %v1121_v22, %v1212_v31 }
  0x2a   :  { %929 = vmatprep.subr.msk.bf16.mxu0 %vm928_vm8, %v982_v17  ;;  %vm946_vm11 = vmpackc.low %vm76_vm4, %vm72_vm3  ;;  %vm77_vm3 = vcmp.eq.s32.totalorder %v1118_v21, %v1224_v33  ;;  %vm81_vm4 = vcmp.eq.s32.totalorder %v1121_v22, %v1224_v33 }
  0x2b   :  { %891 = vmatmul.mubr.msk.bf16.gmra.mrb[4].mxu0 %vm371_vm12, %v978_v38  ;;  %947 = vmatprep.subr.msk.bf16.mxu1 %vm946_vm11, %v982_v17  ;;  %vm930_vm15 = vmpackc.low %vm73_vm7, %vm69_vm6  ;;  %vm79_vm6 = vcmp.eq.s32.totalorder %v1118_v21, %v1235_v34  ;;  %vm83_vm7 = vcmp.eq.s32.totalorder %v1121_v22, %v1235_v34  ;;  %vm776_vm11 = vcmp.lt.s32.totalorder %v28_v0, 512 }
  0x2c   :  { %917 = vmatmul.mubr.msk.bf16.gmra.mrb[4].mxu1 %vm371_vm12, %v978_v38  ;;  %931 = vmatpush1.bf16.msk.msra.mxu0 %vm930_vm15, %v982_v17  ;;  %vm948_vm2 = vmpackc.low %vm75_vm10, %vm71_vm9  ;;  %vm494_vm10 = vcmask 523264  }
  0x2d   :  { %949 = vmatpush1.bf16.msk.msra.mxu1 %vm948_vm2, %v982_v17  ;;  %vm932_vm5 = vmpackc.low %vm82_vm14, %vm78_vm13  ;;  %533 = vmatprep.mubr.bf16.mxu0 %v981_v1 }
  0x2e   :  { %933 = vmatprep.subr.msk.bf16.mxu0 %vm932_vm5, %v982_v17  ;;  %vm950_vm12 = vmpackc.low %vm84_vm1, %vm80_vm0  ;;  %586 = vmatprep.mubr.bf16.mxu1 %v981_v1 }
  0x2f   :  { %951 = vmatprep.subr.msk.bf16.mxu1 %vm950_vm12, %v982_v17  ;;  %vm934_vm8 = vmpackc.low %vm81_vm4, %vm77_vm3 }
  0x30   :  { %935 = vmatpush1.bf16.msk.msra.mxu0 %vm934_vm8, %v982_v17  ;;  %vm952_vm9 = vmpackc.low %vm83_vm7, %vm79_vm6 }
  0x31   :  { %953 = vmatpush1.bf16.msk.msra.mxu1 %vm952_vm9, %v982_v17 }
  0x33   :  { %936 = vmatmul.mubr.msk.bf16.vlgmr.msra.gmra.mrb[0].mxu0 %vm494_vm10, %v979_v39 }
  0x34   :  { %954 = vmatmul.mubr.msk.bf16.vlgmr.msra.gmra.mrb[0].mxu1 %vm494_vm10, %v979_v39  ;;  %543 = vmatprep.mubr.bf16.mxu0 %v981_v1 }
  0x35   :  { %596 = vmatprep.mubr.bf16.mxu1 %v981_v1 }
  0x3b   :  { %937 = vmatmul.mubr.msk.bf16.gmra.mrb[4].mxu0 %vm494_vm10, %v980_v40 }
  0x3c   :  { %955 = vmatmul.mubr.msk.bf16.gmra.mrb[4].mxu1 %vm494_vm10, %v980_v40 }
  0x82   :  { %v614_v41 = vpop.permute.xlu0 %613  ;;  %v624_v42 = vpop.permute.xlu1 %623 }
  0x86   :  { %v619_v43 = vpop.permute.xlu0 %618  ;;  %v629_v44 = vpop.permute.xlu1 %628 }
  0x8c   :  { %v670_v4 = vpop.permute.xlu0 %669 }
  0x8d   :  { %v675_v5 = vpop.permute.xlu1 %674 }
  0x90   :  { %v680_v34 = vpop.permute.xlu0 %679 }
 0x106   :  { %v535_v45 = vpop.f32.mrb[0].mxu0 }
 0x107   :  { %v631_v46 = vadd.f32 %v614_v41, %v535_v45  ;;  %v588_v47 = vpop.f32.mrb[0].mxu1  ;;  %v537_v48 = vpop.f32.mrb[1].mxu0 }
 0x108   :  { %v633_v49 = vadd.f32 %v614_v41, %v588_v47  ;;  %v632_v50 = vadd.f32 %v614_v41, %v537_v48  ;;  %v590_v51 = vpop.f32.mrb[1].mxu1  ;;  %v539_v52 = vpop.f32.mrb[2].mxu0 }
 0x109   :  { %v647_v53 = vmax.f32 %v631_v46, 0.0  ;;  %v634_v54 = vadd.f32 %v614_v41, %v590_v51  ;;  %v635_v55 = vadd.f32 %v619_v43, %v539_v52  ;;  %v592_v56 = vpop.f32.mrb[2].mxu1  ;;  %v541_v57 = vpop.f32.mrb[3].mxu0 }
 0x10a   :  { %v649_v58 = vmax.f32 %v633_v49, 0.0  ;;  %v648_v59 = vmax.f32 %v632_v50, 0.0  ;;  %v637_v60 = vadd.f32 %v619_v43, %v592_v56  ;;  %v636_v61 = vadd.f32 %v619_v43, %v541_v57  ;;  %v594_v62 = vpop.f32.mrb[3].mxu1  ;;  %v685_v46 = vpop.permute.xlu1 %684 }
 0x10b   :  { %v650_v63 = vmax.f32 %v634_v54, 0.0  ;;  %v651_v1 = vmax.f32 %v635_v55, 0.0  ;;  %v638_v2 = vadd.f32 %v619_v43, %v594_v62  ;;  %v687_v8 = vmul.f32 %v670_v4, %v647_v53 }
 0x10c   :  { %v653_v6 = vmax.f32 %v637_v60, 0.0  ;;  %v652_v7 = vmax.f32 %v636_v61, 0.0  ;;  %v689_v11 = vmul.f32 %v670_v4, %v649_v58  ;;  %v688_v12 = vmul.f32 %v670_v4, %v648_v59 }
 0x10d   :  { %v691_v9 = vmul.f32 %v675_v5, %v651_v1  ;;  %v654_v10 = vmax.f32 %v638_v2, 0.0  ;;  %v690_v16 = vmul.f32 %v670_v4, %v650_v63 }
 0x10e   :  { %v693_v13 = vmul.f32 %v675_v5, %v653_v6  ;;  %v692_v14 = vmul.f32 %v675_v5, %v652_v7  ;;  %v545_v15 = vpop.f32.mrb[4].mxu0 }
 0x10f   :  { %v703_v17 = vadd.f32 %v691_v9, %v687_v8  ;;  %v694_v18 = vmul.f32 %v675_v5, %v654_v10  ;;  %v639_v19 = vadd.f32 %v624_v42, %v545_v15  ;;  %v598_v20 = vpop.f32.mrb[4].mxu1  ;;  %v547_v21 = vpop.f32.mrb[5].mxu0 }
 0x110   :  { %v721_v22 = vadd.f32 %v693_v13, %v689_v11  ;;  %v712_v23 = vadd.f32 %v692_v14, %v688_v12  ;;  %v641_v24 = vadd.f32 %v624_v42, %v598_v20  ;;  %v640_v25 = vadd.f32 %v624_v42, %v547_v21  ;;  %v600_v26 = vpop.f32.mrb[5].mxu1  ;;  %v549_v27 = vpop.f32.mrb[6].mxu0 }
 0x111   :  { %v730_v28 = vadd.f32 %v694_v18, %v690_v16  ;;  %v655_v29 = vmax.f32 %v639_v19, 0.0  ;;  %v642_v30 = vadd.f32 %v624_v42, %v600_v26  ;;  %v643_v31 = vadd.f32 %v629_v44, %v549_v27  ;;  %v602_v32 = vpop.f32.mrb[6].mxu1  ;;  %v551_v33 = vpop.f32.mrb[7].mxu0 }
 0x112   :  { %v657_v35 = vmax.f32 %v641_v24, 0.0  ;;  %v656_v36 = vmax.f32 %v640_v25, 0.0  ;;  %v645_v37 = vadd.f32 %v629_v44, %v602_v32  ;;  %v644_v38 = vadd.f32 %v629_v44, %v551_v33  ;;  %v604_v39 = vpop.f32.mrb[7].mxu1 }
 0x113   :  { %v695_v40 = vmul.f32 %v680_v34, %v655_v29  ;;  %v658_v41 = vmax.f32 %v642_v30, 0.0  ;;  %v659_v43 = vmax.f32 %v643_v31, 0.0  ;;  %v646_v45 = vadd.f32 %v629_v44, %v604_v39 }
 0x114   :  { %v697_v47 = vmul.f32 %v680_v34, %v657_v35  ;;  %v696_v48 = vmul.f32 %v680_v34, %v656_v36  ;;  %v661_v49 = vmax.f32 %v645_v37, 0.0  ;;  %v660_v50 = vmax.f32 %v644_v38, 0.0 }
 0x115   :  { %v704_v51 = vadd.f32 %v703_v17, %v695_v40  ;;  %v698_v42 = vmul.f32 %v680_v34, %v658_v41  ;;  %v699_v52 = vmul.f32 %v685_v46, %v659_v43  ;;  %v662_v53 = vmax.f32 %v646_v45, 0.0 }
 0x116   :  { %v722_v54 = vadd.f32 %v721_v22, %v697_v47  ;;  %v713_v55 = vadd.f32 %v712_v23, %v696_v48  ;;  %v701_v56 = vmul.f32 %v685_v46, %v661_v49  ;;  %v700_v57 = vmul.f32 %v685_v46, %v660_v50 }
 0x117   :  { %v731_v58 = vadd.f32 %v730_v28, %v698_v42  ;;  %v705_v59 = vadd.f32 %v704_v51, %v699_v52  ;;  %v702_v60 = vmul.f32 %v685_v46, %v662_v53  ;;  %v983_v12 = vmov 1966171168  }
 0x118   :  { %v723_v61 = vadd.f32 %v722_v54, %v701_v56  ;;  %v714_v62 = vadd.f32 %v713_v55, %v700_v57  ;;  %v752_v13 = vunpack.c.l.s4 %v983_v12  ;;  %v740_v20 = vstv %s1383_s5 }
 0x119   :  { %v706_v63 = vrot.slane %v705_v59, 4  ;;  %v732_v44 = vadd.f32 %v731_v58, %v702_v60 }
 0x11a   :  { %v724_v1 = vrot.slane %v723_v61, 4  ;;  %v715_v2 = vrot.slane %v714_v62, 4  ;;  %v753_v23 = vunpack.c.0.s8 %v752_v13 }
 0x11b   :  { %v707_v4 = vadd.f32 %v706_v63, %v705_v59  ;;  %v733_v5 = vrot.slane %v732_v44, 4 }
 0x11c   :  { %v725_v6 = vadd.f32 %v724_v1, %v723_v61  ;;  %v716_v7 = vadd.f32 %v715_v2, %v714_v62  ;;  %v756_v32 = vsub.s32 %v753_v23, %v1025_v3 }
 0x11d   :  { %v708_v8 = vrot.slane %v707_v4, 2  ;;  %v734_v9 = vadd.f32 %v733_v5, %v732_v44 }
 0x11e   :  { %v726_v10 = vrot.slane %v725_v6, 2  ;;  %v717_v11 = vrot.slane %v716_v7, 2 }
 0x11f   :  { %v709_v14 = vadd.f32 %v708_v8, %v707_v4  ;;  %v735_v15 = vrot.slane %v734_v9, 2 }
 0x120   :  { %v727_v16 = vadd.f32 %v726_v10, %v725_v6  ;;  %v718_v17 = vadd.f32 %v717_v11, %v716_v7 }
 0x121   :  { %v710_v18 = vrot.slane %v709_v14, 1  ;;  %v736_v19 = vadd.f32 %v735_v15, %v734_v9 }
 0x122   :  { %v728_v21 = vrot.slane %v727_v16, 1  ;;  %v719_v22 = vrot.slane %v718_v17, 1 }
 0x123   :  { %v711_v24 = vadd.f32 %v710_v18, %v709_v14  ;;  %v737_v25 = vrot.slane %v736_v19, 1 }
 0x124   :  { %v729_v26 = vadd.f32 %v728_v21, %v727_v16  ;;  %v720_v27 = vadd.f32 %v719_v22, %v718_v17 }
 0x125   :  { %v741_v28 = vadd.f32 %v740_v20, %v711_v24  ;;  %v738_v29 = vadd.f32 %v737_v25, %v736_v19 }
 0x126   :  { %v743_v30 = vadd.f32 %v740_v20, %v729_v26  ;;  %v742_v31 = vadd.f32 %v740_v20, %v720_v27 }
 0x127   :  { %v744_v33 = vadd.f32 %v740_v20, %v738_v29 }
 0x128   :  { %v749_v34 = vcombine.low %v741_v28, %v742_v31 }
 0x129   :  { %v750_v35 = vcombine.low %v743_v30, %v744_v33 }
 0x12a   :  { %v757_v36 = vrot.slane %v749_v34, %v756_v32 }
 0x12b   :  { %v764_v37 = vrot.slane %v750_v35, %v756_v32 }
 0x12d   :  { %v765_v38 = vcombine.low %v757_v36, %v764_v37 }
 0x12f   :  { %v772_v39 = vrot.slane %v765_v38, %v756_v32 }
 0x131   :  { %778 = vst.msk [vmem:[%s1384_s6] sm:$0xf] %vm776_vm11, %v772_v39 }

</bundles_post_ra>
